<compile_context>
chip_gen: v5e
topology: v5e:2x2
jax: 0.10.0
libtpu: 0.0.40
codegen_flags: <defaults>
</compile_context>

<pallas_src>
import functools

import jax
import jax.numpy as jnp
from jax.experimental import pallas as pl
from jax.experimental.pallas import tpu as pltpu

# ----------------------------- config (small synthetic BERT embeddings) -----
VOCAB = 64          # scaled down from 30522
MAX_POS = 16        # scaled down from 512
TYPE_VOCAB = 2
HIDDEN = 128        # scaled down from 768, kept a multiple of 128 (lane-dense)
LN_EPS = 1e-12


# ----------------------------- fused Pallas kernel --------------------------
def _bertnc_kernel(ids_ref,       # SMEM  [B, S] int32   (scalar prefetch)
                   word_ref,      # VMEM  [VOCAB, 1, H]
                   pos_ref,       # VMEM  [S, H]
                   type_ref,      # VMEM  [1, H]          (token_type_ids == 0)
                   gamma_ref,     # VMEM  [1, H]
                   beta_ref,      # VMEM  [1, H]
                   mask_ref,      # VMEM  [B, S] float32
                   out_ref,       # VMEM  [S*B, H]   row s*B + b  <-> token (b, s)
                   invmask_ref,   # VMEM  [B, S] float32
                   acc_ref,       # VMEM scratch [S*B, H]
                   *, batch, seq):
    # Gather word embeddings with the prefetched ids and add the position rows,
    # writing rows directly in (seq, batch)-major order so the final permute is
    # just a free reshape outside the kernel.
    for r in range(seq * batch):
        s, b = divmod(r, batch)
        tok = word_ref[ids_ref[b, s]]                 # (1, H) dynamic row gather
        acc_ref[r:r + 1, :] = tok + pos_ref[s:s + 1, :]

    # token_type_ids are all zero -> single broadcast add of type_emb[0].
    h = acc_ref[...] + type_ref[...]                  # [S*B, H], f32

    # LayerNorm over the hidden (lane) axis, vectorized over all tokens.
    mean = jnp.mean(h, axis=-1, keepdims=True)
    var = jnp.mean(jnp.square(h - mean), axis=-1, keepdims=True)
    normed = (h - mean) * jax.lax.rsqrt(var + LN_EPS)
    out_ref[...] = normed * gamma_ref[...] + beta_ref[...]

    # Second module output: 1.0 - attention_mask.float()
    invmask_ref[...] = 1.0 - mask_ref[...]
    # TODO(synk): dropout after LayerNorm is identity in eval mode, so omitted.


def bertnc_forward(params, input_ids, attention_mask):
    """Mirrors BERTNC.forward:
       (bert.embeddings(input_ids).permute(1, 0, 2), 1.0 - attention_mask.float())."""
    B, S = input_ids.shape
    H = HIDDEN

    word3 = params["word_emb"].reshape(VOCAB, 1, H)   # leading-axis-indexable table
    pos = params["pos_emb"][:S]                       # [S, H]  (position_ids = arange(S))
    typ = params["type_emb"][:1]                      # [1, H]  (token_type_ids = 0)
    gamma = params["ln_g"].reshape(1, H)
    beta = params["ln_b"].reshape(1, H)
    mask_f32 = attention_mask.astype(jnp.float32)

    grid_spec = pltpu.PrefetchScalarGridSpec(
        num_scalar_prefetch=1,                        # input_ids -> SMEM
        grid=(1,),
        in_specs=[
            pl.BlockSpec((VOCAB, 1, H), lambda i, ids: (0, 0, 0)),
            pl.BlockSpec((S, H), lambda i, ids: (0, 0)),
            pl.BlockSpec((1, H), lambda i, ids: (0, 0)),
            pl.BlockSpec((1, H), lambda i, ids: (0, 0)),
            pl.BlockSpec((1, H), lambda i, ids: (0, 0)),
            pl.BlockSpec((B, S), lambda i, ids: (0, 0)),
        ],
        out_specs=[
            pl.BlockSpec((S * B, H), lambda i, ids: (0, 0)),
            pl.BlockSpec((B, S), lambda i, ids: (0, 0)),
        ],
        scratch_shapes=[pltpu.VMEM((S * B, H), jnp.float32)],
    )

    hidden_sb, inv_mask = pl.pallas_call(
        functools.partial(_bertnc_kernel, batch=B, seq=S),
        grid_spec=grid_spec,
        out_shape=(
            jax.ShapeDtypeStruct((S * B, H), jnp.float32),
            jax.ShapeDtypeStruct((B, S), jnp.float32),
        ),
        compiler_params=pltpu.CompilerParams(dimension_semantics=("arbitrary",)),
    )(input_ids, word3, pos, typ, gamma, beta, mask_f32)

    # [S*B, H] -> [S, B, H] is a contiguity-preserving (free) reshape, not a
    # transpose: the kernel already wrote rows in (seq, batch)-major order.
    return hidden_sb.reshape(S, B, H), inv_mask


# ----------------------------- synthetic weights ----------------------------
def init_params(key):
    # TODO(synk): pretrained bert-base-uncased weights cannot be loaded here;
    # deterministic synthetic weights are used instead.
    k_word, k_pos, k_type = jax.random.split(key, 3)
    scale = 0.02
    return {
        "word_emb": scale * jax.random.normal(k_word, (VOCAB, HIDDEN), jnp.float32),
        "pos_emb": scale * jax.random.normal(k_pos, (MAX_POS, HIDDEN), jnp.float32),
        "type_emb": scale * jax.random.normal(k_type, (TYPE_VOCAB, HIDDEN), jnp.float32),
        "ln_g": jnp.ones((HIDDEN,), jnp.float32),
        "ln_b": jnp.zeros((HIDDEN,), jnp.float32),
    }


# ----------------------------- pure-JAX reference ----------------------------
def bertnc_reference(params, input_ids, attention_mask):
    B, S = input_ids.shape
    tok = jnp.take(params["word_emb"], input_ids, axis=0)            # [B,S,H]
    h = tok + params["pos_emb"][:S][None, :, :] + params["type_emb"][0][None, None, :]
    mean = jnp.mean(h, axis=-1, keepdims=True)
    var = jnp.mean(jnp.square(h - mean), axis=-1, keepdims=True)
    ln = (h - mean) * jax.lax.rsqrt(var + LN_EPS) * params["ln_g"] + params["ln_b"]
    return jnp.transpose(ln, (1, 0, 2)), 1.0 - attention_mask.astype(jnp.float32)


if __name__ == "__main__":
    B, S = 2, 8
    key = jax.random.PRNGKey(0)
    pkey, ikey = jax.random.split(key)
    params = init_params(pkey)

    input_ids = jax.random.randint(ikey, (B, S), 0, VOCAB, dtype=jnp.int32)
    attention_mask = jnp.array(
        [[1, 1, 1, 1, 1, 1, 1, 1],
         [1, 1, 1, 1, 1, 1, 0, 0]], dtype=jnp.int32)

    hidden_sbh, inv_mask = bertnc_forward(params, input_ids, attention_mask)
    jax.block_until_ready(hidden_sbh)
    jax.block_until_ready(inv_mask)

    assert hidden_sbh.shape == (S, B, HIDDEN)
    assert inv_mask.shape == (B, S)

    ref_hidden, ref_inv = bertnc_reference(params, input_ids, attention_mask)
    assert bool(jnp.allclose(hidden_sbh, ref_hidden, atol=1e-4, rtol=1e-4))
    assert bool(jnp.allclose(inv_mask, ref_inv))

    print("KERNEL_OK")
</pallas_src>

<mosaic_0001>
module attributes {stable_mosaic.version = 11 : i64} {
  func.func @_bertnc_kernel(%arg0: i32, %arg1: memref<2x8xi32, #tpu.memory_space<smem>>, %arg2: memref<64x1x128xf32, #tpu.memory_space<vmem>>, %arg3: memref<8x128xf32, #tpu.memory_space<vmem>>, %arg4: memref<1x128xf32, #tpu.memory_space<vmem>>, %arg5: memref<1x128xf32, #tpu.memory_space<vmem>>, %arg6: memref<1x128xf32, #tpu.memory_space<vmem>>, %arg7: memref<2x8xf32, #tpu.memory_space<vmem>>, %arg8: memref<16x128xf32, #tpu.memory_space<vmem>>, %arg9: memref<2x8xf32, #tpu.memory_space<vmem>>, %arg10: memref<16x128xf32, #tpu.memory_space<vmem>>) attributes {dimension_semantics = [#tpu.dimension_semantics<arbitrary>], iteration_bounds = array<i64: 1>, scalar_prefetch = 1 : i64, scratch_operands = 1 : i64, tpu.core_type = #tpu.core_type<tc>, window_params = [{pipeline_mode = #tpu.pipeline_mode<synchronous>, transform_indices = @transform_0, window_bounds = array<i64: 64, 1, 128>}, {pipeline_mode = #tpu.pipeline_mode<synchronous>, transform_indices = @transform_1, window_bounds = array<i64: 8, 128>}, {pipeline_mode = #tpu.pipeline_mode<synchronous>, transform_indices = @transform_2, window_bounds = array<i64: 1, 128>}, {pipeline_mode = #tpu.pipeline_mode<synchronous>, transform_indices = @transform_3, window_bounds = array<i64: 1, 128>}, {pipeline_mode = #tpu.pipeline_mode<synchronous>, transform_indices = @transform_4, window_bounds = array<i64: 1, 128>}, {pipeline_mode = #tpu.pipeline_mode<synchronous>, transform_indices = @transform_5, window_bounds = array<i64: 2, 8>}, {pipeline_mode = #tpu.pipeline_mode<synchronous>, transform_indices = @transform_6, window_bounds = array<i64: 16, 128>}, {pipeline_mode = #tpu.pipeline_mode<synchronous>, transform_indices = @transform_7, window_bounds = array<i64: 2, 8>}]} {
    %c0 = arith.constant 0 : index
    %c0_0 = arith.constant 0 : index
    %0 = memref.load %arg1[%c0, %c0_0] : memref<2x8xi32, #tpu.memory_space<smem>>
    %1 = arith.index_cast %0 : i32 to index
    %c0_1 = arith.constant 0 : index
    %c0_2 = arith.constant 0 : index
    %2 = vector.load %arg2[%1, %c0_1, %c0_2] : memref<64x1x128xf32, #tpu.memory_space<vmem>>, vector<1x1x128xf32>
    %3 = vector.shape_cast %2 : vector<1x1x128xf32> to vector<1x128xf32>
    %c0_3 = arith.constant 0 : index
    %c0_4 = arith.constant 0 : index
    %4 = vector.load %arg3[%c0_3, %c0_4] : memref<8x128xf32, #tpu.memory_space<vmem>>, vector<1x128xf32>
    %5 = arith.addf %3, %4 : vector<1x128xf32>
    %c0_5 = arith.constant 0 : index
    %c0_6 = arith.constant 0 : index
    %6 = vector.load %arg10[%c0_5, %c0_6] : memref<16x128xf32, #tpu.memory_space<vmem>>, vector<1x128xf32>
    tpu.vector_store %arg10[%c0_5, %c0_6], %5 {strides = array<i32>} : memref<16x128xf32, #tpu.memory_space<vmem>>, vector<1x128xf32>,
    %c1 = arith.constant 1 : index
    %c0_7 = arith.constant 0 : index
    %7 = memref.load %arg1[%c1, %c0_7] : memref<2x8xi32, #tpu.memory_space<smem>>
    %8 = arith.index_cast %7 : i32 to index
    %c0_8 = arith.constant 0 : index
    %c0_9 = arith.constant 0 : index
    %9 = vector.load %arg2[%8, %c0_8, %c0_9] : memref<64x1x128xf32, #tpu.memory_space<vmem>>, vector<1x1x128xf32>
    %10 = vector.shape_cast %9 : vector<1x1x128xf32> to vector<1x128xf32>
    %c0_10 = arith.constant 0 : index
    %c0_11 = arith.constant 0 : index
    %11 = vector.load %arg3[%c0_10, %c0_11] : memref<8x128xf32, #tpu.memory_space<vmem>>, vector<1x128xf32>
    %12 = arith.addf %10, %11 : vector<1x128xf32>
    %c1_12 = arith.constant 1 : index
    %c0_13 = arith.constant 0 : index
    %13 = vector.load %arg10[%c1_12, %c0_13] : memref<16x128xf32, #tpu.memory_space<vmem>>, vector<1x128xf32>
    tpu.vector_store %arg10[%c1_12, %c0_13], %12 {strides = array<i32>} : memref<16x128xf32, #tpu.memory_space<vmem>>, vector<1x128xf32>,
    %c0_14 = arith.constant 0 : index
    %c1_15 = arith.constant 1 : index
    %14 = memref.load %arg1[%c0_14, %c1_15] : memref<2x8xi32, #tpu.memory_space<smem>>
    %15 = arith.index_cast %14 : i32 to index
    %c0_16 = arith.constant 0 : index
    %c0_17 = arith.constant 0 : index
    %16 = vector.load %arg2[%15, %c0_16, %c0_17] : memref<64x1x128xf32, #tpu.memory_space<vmem>>, vector<1x1x128xf32>
    %17 = vector.shape_cast %16 : vector<1x1x128xf32> to vector<1x128xf32>
    %c1_18 = arith.constant 1 : index
    %c0_19 = arith.constant 0 : index
    %18 = vector.load %arg3[%c1_18, %c0_19] : memref<8x128xf32, #tpu.memory_space<vmem>>, vector<1x128xf32>
    %19 = arith.addf %17, %18 : vector<1x128xf32>
    %c2 = arith.constant 2 : index
    %c0_20 = arith.constant 0 : index
    %20 = vector.load %arg10[%c2, %c0_20] : memref<16x128xf32, #tpu.memory_space<vmem>>, vector<1x128xf32>
    tpu.vector_store %arg10[%c2, %c0_20], %19 {strides = array<i32>} : memref<16x128xf32, #tpu.memory_space<vmem>>, vector<1x128xf32>,
    %c1_21 = arith.constant 1 : index
    %c1_22 = arith.constant 1 : index
    %21 = memref.load %arg1[%c1_21, %c1_22] : memref<2x8xi32, #tpu.memory_space<smem>>
    %22 = arith.index_cast %21 : i32 to index
    %c0_23 = arith.constant 0 : index
    %c0_24 = arith.constant 0 : index
    %23 = vector.load %arg2[%22, %c0_23, %c0_24] : memref<64x1x128xf32, #tpu.memory_space<vmem>>, vector<1x1x128xf32>
    %24 = vector.shape_cast %23 : vector<1x1x128xf32> to vector<1x128xf32>
    %c1_25 = arith.constant 1 : index
    %c0_26 = arith.constant 0 : index
    %25 = vector.load %arg3[%c1_25, %c0_26] : memref<8x128xf32, #tpu.memory_space<vmem>>, vector<1x128xf32>
    %26 = arith.addf %24, %25 : vector<1x128xf32>
    %c3 = arith.constant 3 : index
    %c0_27 = arith.constant 0 : index
    %27 = vector.load %arg10[%c3, %c0_27] : memref<16x128xf32, #tpu.memory_space<vmem>>, vector<1x128xf32>
    tpu.vector_store %arg10[%c3, %c0_27], %26 {strides = array<i32>} : memref<16x128xf32, #tpu.memory_space<vmem>>, vector<1x128xf32>,
    %c0_28 = arith.constant 0 : index
    %c2_29 = arith.constant 2 : index
    %28 = memref.load %arg1[%c0_28, %c2_29] : memref<2x8xi32, #tpu.memory_space<smem>>
    %29 = arith.index_cast %28 : i32 to index
    %c0_30 = arith.constant 0 : index
    %c0_31 = arith.constant 0 : index
    %30 = vector.load %arg2[%29, %c0_30, %c0_31] : memref<64x1x128xf32, #tpu.memory_space<vmem>>, vector<1x1x128xf32>
    %31 = vector.shape_cast %30 : vector<1x1x128xf32> to vector<1x128xf32>
    %c2_32 = arith.constant 2 : index
    %c0_33 = arith.constant 0 : index
    %32 = vector.load %arg3[%c2_32, %c0_33] : memref<8x128xf32, #tpu.memory_space<vmem>>, vector<1x128xf32>
    %33 = arith.addf %31, %32 : vector<1x128xf32>
    %c4 = arith.constant 4 : index
    %c0_34 = arith.constant 0 : index
    %34 = vector.load %arg10[%c4, %c0_34] : memref<16x128xf32, #tpu.memory_space<vmem>>, vector<1x128xf32>
    tpu.vector_store %arg10[%c4, %c0_34], %33 {strides = array<i32>} : memref<16x128xf32, #tpu.memory_space<vmem>>, vector<1x128xf32>,
    %c1_35 = arith.constant 1 : index
    %c2_36 = arith.constant 2 : index
    %35 = memref.load %arg1[%c1_35, %c2_36] : memref<2x8xi32, #tpu.memory_space<smem>>
    %36 = arith.index_cast %35 : i32 to index
    %c0_37 = arith.constant 0 : index
    %c0_38 = arith.constant 0 : index
    %37 = vector.load %arg2[%36, %c0_37, %c0_38] : memref<64x1x128xf32, #tpu.memory_space<vmem>>, vector<1x1x128xf32>
    %38 = vector.shape_cast %37 : vector<1x1x128xf32> to vector<1x128xf32>
    %c2_39 = arith.constant 2 : index
    %c0_40 = arith.constant 0 : index
    %39 = vector.load %arg3[%c2_39, %c0_40] : memref<8x128xf32, #tpu.memory_space<vmem>>, vector<1x128xf32>
    %40 = arith.addf %38, %39 : vector<1x128xf32>
    %c5 = arith.constant 5 : index
    %c0_41 = arith.constant 0 : index
    %41 = vector.load %arg10[%c5, %c0_41] : memref<16x128xf32, #tpu.memory_space<vmem>>, vector<1x128xf32>
    tpu.vector_store %arg10[%c5, %c0_41], %40 {strides = array<i32>} : memref<16x128xf32, #tpu.memory_space<vmem>>, vector<1x128xf32>,
    %c0_42 = arith.constant 0 : index
    %c3_43 = arith.constant 3 : index
    %42 = memref.load %arg1[%c0_42, %c3_43] : memref<2x8xi32, #tpu.memory_space<smem>>
    %43 = arith.index_cast %42 : i32 to index
    %c0_44 = arith.constant 0 : index
    %c0_45 = arith.constant 0 : index
    %44 = vector.load %arg2[%43, %c0_44, %c0_45] : memref<64x1x128xf32, #tpu.memory_space<vmem>>, vector<1x1x128xf32>
    %45 = vector.shape_cast %44 : vector<1x1x128xf32> to vector<1x128xf32>
    %c3_46 = arith.constant 3 : index
    %c0_47 = arith.constant 0 : index
    %46 = vector.load %arg3[%c3_46, %c0_47] : memref<8x128xf32, #tpu.memory_space<vmem>>, vector<1x128xf32>
    %47 = arith.addf %45, %46 : vector<1x128xf32>
    %c6 = arith.constant 6 : index
    %c0_48 = arith.constant 0 : index
    %48 = vector.load %arg10[%c6, %c0_48] : memref<16x128xf32, #tpu.memory_space<vmem>>, vector<1x128xf32>
    tpu.vector_store %arg10[%c6, %c0_48], %47 {strides = array<i32>} : memref<16x128xf32, #tpu.memory_space<vmem>>, vector<1x128xf32>,
    %c1_49 = arith.constant 1 : index
    %c3_50 = arith.constant 3 : index
    %49 = memref.load %arg1[%c1_49, %c3_50] : memref<2x8xi32, #tpu.memory_space<smem>>
    %50 = arith.index_cast %49 : i32 to index
    %c0_51 = arith.constant 0 : index
    %c0_52 = arith.constant 0 : index
    %51 = vector.load %arg2[%50, %c0_51, %c0_52] : memref<64x1x128xf32, #tpu.memory_space<vmem>>, vector<1x1x128xf32>
    %52 = vector.shape_cast %51 : vector<1x1x128xf32> to vector<1x128xf32>
    %c3_53 = arith.constant 3 : index
    %c0_54 = arith.constant 0 : index
    %53 = vector.load %arg3[%c3_53, %c0_54] : memref<8x128xf32, #tpu.memory_space<vmem>>, vector<1x128xf32>
    %54 = arith.addf %52, %53 : vector<1x128xf32>
    %c7 = arith.constant 7 : index
    %c0_55 = arith.constant 0 : index
    %55 = vector.load %arg10[%c7, %c0_55] : memref<16x128xf32, #tpu.memory_space<vmem>>, vector<1x128xf32>
    tpu.vector_store %arg10[%c7, %c0_55], %54 {strides = array<i32>} : memref<16x128xf32, #tpu.memory_space<vmem>>, vector<1x128xf32>,
    %c0_56 = arith.constant 0 : index
    %c4_57 = arith.constant 4 : index
    %56 = memref.load %arg1[%c0_56, %c4_57] : memref<2x8xi32, #tpu.memory_space<smem>>
    %57 = arith.index_cast %56 : i32 to index
    %c0_58 = arith.constant 0 : index
    %c0_59 = arith.constant 0 : index
    %58 = vector.load %arg2[%57, %c0_58, %c0_59] : memref<64x1x128xf32, #tpu.memory_space<vmem>>, vector<1x1x128xf32>
    %59 = vector.shape_cast %58 : vector<1x1x128xf32> to vector<1x128xf32>
    %c4_60 = arith.constant 4 : index
    %c0_61 = arith.constant 0 : index
    %60 = vector.load %arg3[%c4_60, %c0_61] : memref<8x128xf32, #tpu.memory_space<vmem>>, vector<1x128xf32>
    %61 = arith.addf %59, %60 : vector<1x128xf32>
    %c8 = arith.constant 8 : index
    %c0_62 = arith.constant 0 : index
    %62 = vector.load %arg10[%c8, %c0_62] : memref<16x128xf32, #tpu.memory_space<vmem>>, vector<1x128xf32>
    tpu.vector_store %arg10[%c8, %c0_62], %61 {strides = array<i32>} : memref<16x128xf32, #tpu.memory_space<vmem>>, vector<1x128xf32>,
    %c1_63 = arith.constant 1 : index
    %c4_64 = arith.constant 4 : index
    %63 = memref.load %arg1[%c1_63, %c4_64] : memref<2x8xi32, #tpu.memory_space<smem>>
    %64 = arith.index_cast %63 : i32 to index
    %c0_65 = arith.constant 0 : index
    %c0_66 = arith.constant 0 : index
    %65 = vector.load %arg2[%64, %c0_65, %c0_66] : memref<64x1x128xf32, #tpu.memory_space<vmem>>, vector<1x1x128xf32>
    %66 = vector.shape_cast %65 : vector<1x1x128xf32> to vector<1x128xf32>
    %c4_67 = arith.constant 4 : index
    %c0_68 = arith.constant 0 : index
    %67 = vector.load %arg3[%c4_67, %c0_68] : memref<8x128xf32, #tpu.memory_space<vmem>>, vector<1x128xf32>
    %68 = arith.addf %66, %67 : vector<1x128xf32>
    %c9 = arith.constant 9 : index
    %c0_69 = arith.constant 0 : index
    %69 = vector.load %arg10[%c9, %c0_69] : memref<16x128xf32, #tpu.memory_space<vmem>>, vector<1x128xf32>
    tpu.vector_store %arg10[%c9, %c0_69], %68 {strides = array<i32>} : memref<16x128xf32, #tpu.memory_space<vmem>>, vector<1x128xf32>,
    %c0_70 = arith.constant 0 : index
    %c5_71 = arith.constant 5 : index
    %70 = memref.load %arg1[%c0_70, %c5_71] : memref<2x8xi32, #tpu.memory_space<smem>>
    %71 = arith.index_cast %70 : i32 to index
    %c0_72 = arith.constant 0 : index
    %c0_73 = arith.constant 0 : index
    %72 = vector.load %arg2[%71, %c0_72, %c0_73] : memref<64x1x128xf32, #tpu.memory_space<vmem>>, vector<1x1x128xf32>
    %73 = vector.shape_cast %72 : vector<1x1x128xf32> to vector<1x128xf32>
    %c5_74 = arith.constant 5 : index
    %c0_75 = arith.constant 0 : index
    %74 = vector.load %arg3[%c5_74, %c0_75] : memref<8x128xf32, #tpu.memory_space<vmem>>, vector<1x128xf32>
    %75 = arith.addf %73, %74 : vector<1x128xf32>
    %c10 = arith.constant 10 : index
    %c0_76 = arith.constant 0 : index
    %76 = vector.load %arg10[%c10, %c0_76] : memref<16x128xf32, #tpu.memory_space<vmem>>, vector<1x128xf32>
    tpu.vector_store %arg10[%c10, %c0_76], %75 {strides = array<i32>} : memref<16x128xf32, #tpu.memory_space<vmem>>, vector<1x128xf32>,
    %c1_77 = arith.constant 1 : index
    %c5_78 = arith.constant 5 : index
    %77 = memref.load %arg1[%c1_77, %c5_78] : memref<2x8xi32, #tpu.memory_space<smem>>
    %78 = arith.index_cast %77 : i32 to index
    %c0_79 = arith.constant 0 : index
    %c0_80 = arith.constant 0 : index
    %79 = vector.load %arg2[%78, %c0_79, %c0_80] : memref<64x1x128xf32, #tpu.memory_space<vmem>>, vector<1x1x128xf32>
    %80 = vector.shape_cast %79 : vector<1x1x128xf32> to vector<1x128xf32>
    %c5_81 = arith.constant 5 : index
    %c0_82 = arith.constant 0 : index
    %81 = vector.load %arg3[%c5_81, %c0_82] : memref<8x128xf32, #tpu.memory_space<vmem>>, vector<1x128xf32>
    %82 = arith.addf %80, %81 : vector<1x128xf32>
    %c11 = arith.constant 11 : index
    %c0_83 = arith.constant 0 : index
    %83 = vector.load %arg10[%c11, %c0_83] : memref<16x128xf32, #tpu.memory_space<vmem>>, vector<1x128xf32>
    tpu.vector_store %arg10[%c11, %c0_83], %82 {strides = array<i32>} : memref<16x128xf32, #tpu.memory_space<vmem>>, vector<1x128xf32>,
    %c0_84 = arith.constant 0 : index
    %c6_85 = arith.constant 6 : index
    %84 = memref.load %arg1[%c0_84, %c6_85] : memref<2x8xi32, #tpu.memory_space<smem>>
    %85 = arith.index_cast %84 : i32 to index
    %c0_86 = arith.constant 0 : index
    %c0_87 = arith.constant 0 : index
    %86 = vector.load %arg2[%85, %c0_86, %c0_87] : memref<64x1x128xf32, #tpu.memory_space<vmem>>, vector<1x1x128xf32>
    %87 = vector.shape_cast %86 : vector<1x1x128xf32> to vector<1x128xf32>
    %c6_88 = arith.constant 6 : index
    %c0_89 = arith.constant 0 : index
    %88 = vector.load %arg3[%c6_88, %c0_89] : memref<8x128xf32, #tpu.memory_space<vmem>>, vector<1x128xf32>
    %89 = arith.addf %87, %88 : vector<1x128xf32>
    %c12 = arith.constant 12 : index
    %c0_90 = arith.constant 0 : index
    %90 = vector.load %arg10[%c12, %c0_90] : memref<16x128xf32, #tpu.memory_space<vmem>>, vector<1x128xf32>
    tpu.vector_store %arg10[%c12, %c0_90], %89 {strides = array<i32>} : memref<16x128xf32, #tpu.memory_space<vmem>>, vector<1x128xf32>,
    %c1_91 = arith.constant 1 : index
    %c6_92 = arith.constant 6 : index
    %91 = memref.load %arg1[%c1_91, %c6_92] : memref<2x8xi32, #tpu.memory_space<smem>>
    %92 = arith.index_cast %91 : i32 to index
    %c0_93 = arith.constant 0 : index
    %c0_94 = arith.constant 0 : index
    %93 = vector.load %arg2[%92, %c0_93, %c0_94] : memref<64x1x128xf32, #tpu.memory_space<vmem>>, vector<1x1x128xf32>
    %94 = vector.shape_cast %93 : vector<1x1x128xf32> to vector<1x128xf32>
    %c6_95 = arith.constant 6 : index
    %c0_96 = arith.constant 0 : index
    %95 = vector.load %arg3[%c6_95, %c0_96] : memref<8x128xf32, #tpu.memory_space<vmem>>, vector<1x128xf32>
    %96 = arith.addf %94, %95 : vector<1x128xf32>
    %c13 = arith.constant 13 : index
    %c0_97 = arith.constant 0 : index
    %97 = vector.load %arg10[%c13, %c0_97] : memref<16x128xf32, #tpu.memory_space<vmem>>, vector<1x128xf32>
    tpu.vector_store %arg10[%c13, %c0_97], %96 {strides = array<i32>} : memref<16x128xf32, #tpu.memory_space<vmem>>, vector<1x128xf32>,
    %c0_98 = arith.constant 0 : index
    %c7_99 = arith.constant 7 : index
    %98 = memref.load %arg1[%c0_98, %c7_99] : memref<2x8xi32, #tpu.memory_space<smem>>
    %99 = arith.index_cast %98 : i32 to index
    %c0_100 = arith.constant 0 : index
    %c0_101 = arith.constant 0 : index
    %100 = vector.load %arg2[%99, %c0_100, %c0_101] : memref<64x1x128xf32, #tpu.memory_space<vmem>>, vector<1x1x128xf32>
    %101 = vector.shape_cast %100 : vector<1x1x128xf32> to vector<1x128xf32>
    %c7_102 = arith.constant 7 : index
    %c0_103 = arith.constant 0 : index
    %102 = vector.load %arg3[%c7_102, %c0_103] : memref<8x128xf32, #tpu.memory_space<vmem>>, vector<1x128xf32>
    %103 = arith.addf %101, %102 : vector<1x128xf32>
    %c14 = arith.constant 14 : index
    %c0_104 = arith.constant 0 : index
    %104 = vector.load %arg10[%c14, %c0_104] : memref<16x128xf32, #tpu.memory_space<vmem>>, vector<1x128xf32>
    tpu.vector_store %arg10[%c14, %c0_104], %103 {strides = array<i32>} : memref<16x128xf32, #tpu.memory_space<vmem>>, vector<1x128xf32>,
    %c1_105 = arith.constant 1 : index
    %c7_106 = arith.constant 7 : index
    %105 = memref.load %arg1[%c1_105, %c7_106] : memref<2x8xi32, #tpu.memory_space<smem>>
    %106 = arith.index_cast %105 : i32 to index
    %c0_107 = arith.constant 0 : index
    %c0_108 = arith.constant 0 : index
    %107 = vector.load %arg2[%106, %c0_107, %c0_108] : memref<64x1x128xf32, #tpu.memory_space<vmem>>, vector<1x1x128xf32>
    %108 = vector.shape_cast %107 : vector<1x1x128xf32> to vector<1x128xf32>
    %c7_109 = arith.constant 7 : index
    %c0_110 = arith.constant 0 : index
    %109 = vector.load %arg3[%c7_109, %c0_110] : memref<8x128xf32, #tpu.memory_space<vmem>>, vector<1x128xf32>
    %110 = arith.addf %108, %109 : vector<1x128xf32>
    %c15 = arith.constant 15 : index
    %c0_111 = arith.constant 0 : index
    %111 = vector.load %arg10[%c15, %c0_111] : memref<16x128xf32, #tpu.memory_space<vmem>>, vector<1x128xf32>
    tpu.vector_store %arg10[%c15, %c0_111], %110 {strides = array<i32>} : memref<16x128xf32, #tpu.memory_space<vmem>>, vector<1x128xf32>,
    %c0_112 = arith.constant 0 : index
    %c0_113 = arith.constant 0 : index
    %112 = vector.load %arg10[%c0_112, %c0_113] : memref<16x128xf32, #tpu.memory_space<vmem>>, vector<16x128xf32>
    %c0_114 = arith.constant 0 : index
    %c0_115 = arith.constant 0 : index
    %113 = vector.load %arg4[%c0_114, %c0_115] : memref<1x128xf32, #tpu.memory_space<vmem>>, vector<1x128xf32>
    %114 = vector.broadcast %113 : vector<1x128xf32> to vector<16x128xf32>
    %115 = arith.addf %112, %114 : vector<16x128xf32>
    %cst = arith.constant dense<0.000000e+00> : vector<16xf32>
    %116 = vector.multi_reduction <add>, %115, %cst [1] : vector<16x128xf32> to vector<16xf32>
    %117 = vector.shape_cast %116 : vector<16xf32> to vector<16x1xf32>
    %cst_116 = arith.constant 1.280000e+02 : f32
    %118 = vector.broadcast %cst_116 : f32 to vector<16x1xf32>
    %119 = arith.divf %117, %118 : vector<16x1xf32>
    %120 = vector.broadcast %119 : vector<16x1xf32> to vector<16x128xf32>
    %121 = arith.subf %115, %120 : vector<16x128xf32>
    %122 = arith.mulf %121, %121 : vector<16x128xf32>
    %cst_117 = arith.constant dense<0.000000e+00> : vector<16xf32>
    %123 = vector.multi_reduction <add>, %122, %cst_117 [1] : vector<16x128xf32> to vector<16xf32>
    %124 = vector.shape_cast %123 : vector<16xf32> to vector<16x1xf32>
    %cst_118 = arith.constant 1.280000e+02 : f32
    %125 = vector.broadcast %cst_118 : f32 to vector<16x1xf32>
    %126 = arith.divf %124, %125 : vector<16x1xf32>
    %127 = vector.broadcast %119 : vector<16x1xf32> to vector<16x128xf32>
    %128 = arith.subf %115, %127 : vector<16x128xf32>
    %cst_119 = arith.constant 9.99999996E-13 : f32
    %129 = vector.broadcast %cst_119 : f32 to vector<16x1xf32>
    %130 = arith.addf %126, %129 : vector<16x1xf32>
    %131 = math.rsqrt %130 : vector<16x1xf32>
    %132 = vector.broadcast %131 : vector<16x1xf32> to vector<16x128xf32>
    %133 = arith.mulf %128, %132 : vector<16x128xf32>
    %c0_120 = arith.constant 0 : index
    %c0_121 = arith.constant 0 : index
    %134 = vector.load %arg5[%c0_120, %c0_121] : memref<1x128xf32, #tpu.memory_space<vmem>>, vector<1x128xf32>
    %135 = vector.broadcast %134 : vector<1x128xf32> to vector<16x128xf32>
    %136 = arith.mulf %133, %135 : vector<16x128xf32>
    %c0_122 = arith.constant 0 : index
    %c0_123 = arith.constant 0 : index
    %137 = vector.load %arg6[%c0_122, %c0_123] : memref<1x128xf32, #tpu.memory_space<vmem>>, vector<1x128xf32>
    %138 = vector.broadcast %137 : vector<1x128xf32> to vector<16x128xf32>
    %139 = arith.addf %136, %138 : vector<16x128xf32>
    %c0_124 = arith.constant 0 : index
    %c0_125 = arith.constant 0 : index
    %140 = vector.load %arg8[%c0_124, %c0_125] : memref<16x128xf32, #tpu.memory_space<vmem>>, vector<16x128xf32>
    tpu.vector_store %arg8[%c0_124, %c0_125], %139 {strides = array<i32>} : memref<16x128xf32, #tpu.memory_space<vmem>>, vector<16x128xf32>,
    %c0_126 = arith.constant 0 : index
    %c0_127 = arith.constant 0 : index
    %141 = vector.load %arg7[%c0_126, %c0_127] : memref<2x8xf32, #tpu.memory_space<vmem>>, vector<2x8xf32>
    %cst_128 = arith.constant 1.000000e+00 : f32
    %142 = vector.broadcast %cst_128 : f32 to vector<2x8xf32>
    %143 = arith.subf %142, %141 : vector<2x8xf32>
    %c0_129 = arith.constant 0 : index
    %c0_130 = arith.constant 0 : index
    %144 = vector.load %arg9[%c0_129, %c0_130] : memref<2x8xf32, #tpu.memory_space<vmem>>, vector<2x8xf32>
    tpu.vector_store %arg9[%c0_129, %c0_130], %143 {strides = array<i32>} : memref<2x8xf32, #tpu.memory_space<vmem>>, vector<2x8xf32>,
    return
  }
  func.func @transform_0(%arg0: i32, %arg1: memref<2x8xi32, #tpu.memory_space<smem>>) -> (i32, i32, i32) {
    %c0_i32 = arith.constant 0 : i32
    %c0_i32_0 = arith.constant 0 : i32
    %c0_i32_1 = arith.constant 0 : i32
    %c0_i32_2 = arith.constant 0 : i32
    return %c0_i32, %c0_i32_0, %c0_i32_1 : i32, i32, i32
  }
  func.func @transform_1(%arg0: i32, %arg1: memref<2x8xi32, #tpu.memory_space<smem>>) -> (i32, i32) {
    %c0_i32 = arith.constant 0 : i32
    %c0_i32_0 = arith.constant 0 : i32
    %c0_i32_1 = arith.constant 0 : i32
    return %c0_i32, %c0_i32_0 : i32, i32
  }
  func.func @transform_2(%arg0: i32, %arg1: memref<2x8xi32, #tpu.memory_space<smem>>) -> (i32, i32) {
    %c0_i32 = arith.constant 0 : i32
    %c0_i32_0 = arith.constant 0 : i32
    %c0_i32_1 = arith.constant 0 : i32
    return %c0_i32, %c0_i32_0 : i32, i32
  }
  func.func @transform_3(%arg0: i32, %arg1: memref<2x8xi32, #tpu.memory_space<smem>>) -> (i32, i32) {
    %c0_i32 = arith.constant 0 : i32
    %c0_i32_0 = arith.constant 0 : i32
    %c0_i32_1 = arith.constant 0 : i32
    return %c0_i32, %c0_i32_0 : i32, i32
  }
  func.func @transform_4(%arg0: i32, %arg1: memref<2x8xi32, #tpu.memory_space<smem>>) -> (i32, i32) {
    %c0_i32 = arith.constant 0 : i32
    %c0_i32_0 = arith.constant 0 : i32
    %c0_i32_1 = arith.constant 0 : i32
    return %c0_i32, %c0_i32_0 : i32, i32
  }
  func.func @transform_5(%arg0: i32, %arg1: memref<2x8xi32, #tpu.memory_space<smem>>) -> (i32, i32) {
    %c0_i32 = arith.constant 0 : i32
    %c0_i32_0 = arith.constant 0 : i32
    %c0_i32_1 = arith.constant 0 : i32
    return %c0_i32, %c0_i32_0 : i32, i32
  }
  func.func @transform_6(%arg0: i32, %arg1: memref<2x8xi32, #tpu.memory_space<smem>>) -> (i32, i32) {
    %c0_i32 = arith.constant 0 : i32
    %c0_i32_0 = arith.constant 0 : i32
    %c0_i32_1 = arith.constant 0 : i32
    return %c0_i32, %c0_i32_0 : i32, i32
  }
  func.func @transform_7(%arg0: i32, %arg1: memref<2x8xi32, #tpu.memory_space<smem>>) -> (i32, i32) {
    %c0_i32 = arith.constant 0 : i32
    %c0_i32_0 = arith.constant 0 : i32
    %c0_i32_1 = arith.constant 0 : i32
    return %c0_i32, %c0_i32_0 : i32, i32
  }
}

</mosaic_0001>

<bundles_post_ra>
// kernel: tpu_custom_call.1
= control target key start
LH: loop header
LB: loop body
LE: loop exit
PB: predicated region body
PF: predicated region fallthrough
CT: control target
= control target key end

     0   :  { %s477_s30 = smov [#allocation4]   ;;  %s572_s0 = inlined_call_operand.hbm [shape: s32[2,8], index: 0, kind: input, shape index: {}]   ;;  %s573_s1 = inlined_call_operand.hbm [shape: f32[64,1,128], index: 1, kind: input, shape index: {}]   ;;  %s574_s2 = inlined_call_operand.hbm [shape: f32[8,128], index: 2, kind: input, shape index: {}]   ;;  %s575_s3 = inlined_call_operand.vmem [shape: f32[1,128], index: 3, kind: input, shape index: {}]   ;;  %s576_s4 = inlined_call_operand.hbm [shape: f32[1,128], index: 4, kind: input, shape index: {}]   ;;  %s577_s5 = inlined_call_operand.vmem [shape: f32[1,128], index: 5, kind: input, shape index: {}]   ;;  %s578_s6 = inlined_call_operand.vmem [shape: f32[2,8], index: 6, kind: input, shape index: {}]   ;;  %s579_s7 = inlined_call_operand.hbm [shape: f32[16,128], index: 7, kind: output, shape index: {0}]   ;;  %s580_s8 = inlined_call_operand.hbm [shape: f32[2,8], index: 8, kind: output, shape index: {1}]  }
   0x1   :  { %s15_s29 = sshll.u32 %s572_s0, 4  ;;  %s16_s29 = int_to_ptr.hbm [resolvable:$true] %s15_s29 }
   0x2   :  { %18 = dma.hbm_to_smem %s16_s29, 32, %s477_s30, [#allocation3] }
   0x3   :  { %467 = dma.done.wait [#allocation3], 32 }
   0x4   :  { %468 = vsyncadd [#allocation3], 4294967264 }
   0x5   :  { %21 = sfence }
   0x6   :  { %22 = vsyncpa [#allocation6], 0 }
   0x7   :  { %23 = vsyncpa [#allocation9], 0 }
   0x8   :  { %24 = vsyncpa [#allocation7], 0  ;;  %s44_s11 = sshll.u32 %s574_s2, 4  ;;  %s45_s11 = int_to_ptr.hbm [resolvable:$true] %s44_s11 }
   0x9   :  { %25 = vsyncpa [#allocation13], 0  ;;  %s478_s12 = smov [#allocation8]   ;;  %s30_s15 = sshll.u32 %s573_s1, 4  ;;  %s31_s15 = int_to_ptr.hbm [resolvable:$true] %s30_s15 }
   0xa   :  { %s46_s13 = sshll.u32 %s478_s12, 4  ;;  %s479_s16 = smov [#allocation5]   ;;  %s47_s13 = int_to_ptr.vmem [resolvable:$true] %s46_s13 }
   0xb   :  { %49 = dma.hbm_to_vmem [thread:$0]  %s45_s11, 128, %s47_s13, [#allocation9]  }
   0xc   :  { %s32_s17 = sshll.u32 %s479_s16, 4  ;;  %s480_s18 = smov 16   ;;  %s33_s17 = int_to_ptr.vmem [resolvable:$true] %s32_s17 }
   0xd   :  { %s481_s19 = smov 1   ;;  %s57_s2 = sshll.u32 %s576_s4, 4  ;;  %s58_s2 = int_to_ptr.hbm [resolvable:$true] %s57_s2 }
   0xe   :  { %38 = dma.hbm_to_vmem [thread:$0]  %s31_s15, 1024, %s33_s17, [#allocation6], %s480_s18, %s480_s18, %s481_s19  }
   0xf   :  { %s482_s22 = smov [#allocation10]  }
  0x10   :  { %s59_s23 = sshll.u32 %s482_s22, 4  ;;  %s60_s23 = int_to_ptr.vmem [resolvable:$true] %s59_s23 }
  0x11   :  { %62 = dma.hbm_to_vmem [thread:$0]  %s58_s2, 16, %s60_s23, [#allocation9]  }
  0x12   :  { %469 = dma.done.wait [#allocation6], 1024  }
  0x13   :  { %470 = vsyncadd [#allocation6], 4294966272 }
  0x14   :  { %471 = dma.done.wait [#allocation9], 144  }
  0x15   :  { %472 = vsyncadd [#allocation9], 4294967152  ;;  %s79_s1 = sld [smem:[#allocation4]]  ;;  %v82_v0 = vld [vmem:[#allocation8] sm:$0x1]  ;;  %v483_v53 = vmov 128.0  }
  0x16   :  { %s300_s24 = sld [smem:[#allocation4 + $0x80]]  ;;  %v88_v1 = vld [vmem:[#allocation8] sm:$0x1]  ;;  %v94_v3 = vld [vmem:[#allocation8 + $0x1] sm:$0x1]  ;;  %329 = vrcp.f32 %v483_v53  ;;  %vm246_vm1 = vcmask 58368  }
  0x17   :  { %s301_s25 = sld [smem:[#allocation4 + $0x1]]  ;;  %v100_v6 = vld [vmem:[#allocation8 + $0x1] sm:$0x1]  ;;  %v106_v9 = vld [vmem:[#allocation8 + $0x2] sm:$0x1] }
  0x18   :  { %s302_s26 = sld [smem:[#allocation4 + $0x81]]  ;;  %v112_v16 = vld [vmem:[#allocation8 + $0x2] sm:$0x1]  ;;  %v118_v18 = vld [vmem:[#allocation8 + $0x3] sm:$0x1] }
  0x19   :  { %s303_s27 = sld [smem:[#allocation4 + $0x2]]  ;;  %v124_v19 = vld [vmem:[#allocation8 + $0x3] sm:$0x1]  ;;  %v130_v20 = vld [vmem:[#allocation8 + $0x4] sm:$0x1] }
  0x1a   :  { %s304_s28 = sld [smem:[#allocation4 + $0x82]]  ;;  %v136_v22 = vld [vmem:[#allocation8 + $0x4] sm:$0x1]  ;;  %v142_v25 = vld [vmem:[#allocation8 + $0x5] sm:$0x1] }
  0x1b   :  { %s80_s29 = scalar_lea.vmem [#allocation5], %s79_s1  ;;  %s305_s12 = sld [smem:[#allocation4 + $0x3]]  ;;  %v148_v27 = vld [vmem:[#allocation8 + $0x5] sm:$0x1]  ;;  %v154_v29 = vld [vmem:[#allocation8 + $0x6] sm:$0x1] }
  0x1c   :  { %v81_v2 = vld [vmem:[%s80_s29] sm:$0x1]  ;;  %s86_s4 = scalar_lea.vmem [#allocation5], %s300_s24  ;;  %s306_s13 = sld [smem:[#allocation4 + $0x83]]  ;;  %v160_v32 = vld [vmem:[#allocation8 + $0x6] sm:$0x1]  ;;  %v330_v54 = vpop.eup %329 }
  0x1d   :  { %v83_v4 = vadd.f32 %v82_v0, %v81_v2  ;;  %v87_v5 = vld [vmem:[%s86_s4] sm:$0x1]  ;;  %s92_s30 = scalar_lea.vmem [#allocation5], %s301_s25  ;;  %s307_s14 = sld [smem:[#allocation4 + $0x4]]  ;;  %v166_v35 = vld [vmem:[#allocation8 + $0x7] sm:$0x1]  ;;  %vm192_vm0 = vweird.f32 %v330_v54 }
  0x1e   :  { %v89_v7 = vadd.f32 %v88_v1, %v87_v5  ;;  %v93_v8 = vld [vmem:[%s92_s30] sm:$0x1]  ;;  %s98_s9 = scalar_lea.vmem [#allocation5], %s302_s26  ;;  %s308_s0 = sld [smem:[#allocation4 + $0x84]]  ;;  %v172_v46 = vld [vmem:[#allocation8 + $0x7] sm:$0x1] }
  0x1f   :  { %84 = vst [vmem:[#allocation2] sm:$0x1] %v83_v4  ;;  %v95_v10 = vadd.f32 %v94_v3, %v93_v8  ;;  %v99_v11 = vld [vmem:[%s98_s9] sm:$0x1]  ;;  %s104_s10 = scalar_lea.vmem [#allocation5], %s303_s27  ;;  %s309_s15 = sld [smem:[#allocation4 + $0x5]] }
  0x20   :  { %90 = vst [vmem:[#allocation2 + $0x1] sm:$0x1] %v89_v7  ;;  %v101_v12 = vadd.f32 %v100_v6, %v99_v11  ;;  %v105_v13 = vld [vmem:[%s104_s10] sm:$0x1]  ;;  %s110_s11 = scalar_lea.vmem [#allocation5], %s304_s28  ;;  %s545_s16 = sld [smem:[#allocation4 + $0x85]] }
  0x21   :  { %96 = vst [vmem:[#allocation2 + $0x2] sm:$0x1] %v95_v10  ;;  %v107_v14 = vadd.f32 %v106_v9, %v105_v13  ;;  %v111_v15 = vld [vmem:[%s110_s11] sm:$0x1]  ;;  %s116_s17 = scalar_lea.vmem [#allocation5], %s305_s12  ;;  %s547_s18 = sld [smem:[#allocation4 + $0x6]] }
  0x22   :  { %102 = vst [vmem:[#allocation2 + $0x3] sm:$0x1] %v101_v12  ;;  %v113_v17 = vadd.f32 %v112_v16, %v111_v15  ;;  %v117_v21 = vld [vmem:[%s116_s17] sm:$0x1]  ;;  %s122_s19 = scalar_lea.vmem [#allocation5], %s306_s13  ;;  %s549_s20 = sld [smem:[#allocation4 + $0x86]] }
  0x23   :  { %108 = vst [vmem:[#allocation2 + $0x4] sm:$0x1] %v107_v14  ;;  %v119_v23 = vadd.f32 %v118_v18, %v117_v21  ;;  %v123_v24 = vld [vmem:[%s122_s19] sm:$0x1]  ;;  %s551_s21 = sld [smem:[#allocation4 + $0x7]]  ;;  %s128_s2 = scalar_lea.vmem [#allocation5], %s307_s14 }
  0x24   :  { %114 = vst [vmem:[#allocation2 + $0x5] sm:$0x1] %v113_v17  ;;  %v125_v26 = vadd.f32 %v124_v19, %v123_v24  ;;  %v129_v28 = vld [vmem:[%s128_s2] sm:$0x1]  ;;  %s134_s22 = scalar_lea.vmem [#allocation5], %s308_s0  ;;  %s314_s1 = sld [smem:[#allocation4 + $0x87]] }
  0x25   :  { %120 = vst [vmem:[#allocation2 + $0x6] sm:$0x1] %v119_v23  ;;  %v131_v30 = vadd.f32 %v130_v20, %v129_v28  ;;  %v135_v31 = vld [vmem:[%s134_s22] sm:$0x1]  ;;  %s140_s23 = scalar_lea.vmem [#allocation5], %s309_s15  ;;  %v188_v55 = vmul.f32 128.0, %v330_v54 }
  0x26   :  { %126 = vst [vmem:[#allocation2 + $0x7] sm:$0x1] %v125_v26  ;;  %v137_v33 = vadd.f32 %v136_v22, %v135_v31  ;;  %v141_v34 = vld [vmem:[%s140_s23] sm:$0x1]  ;;  %s146_s26 = scalar_lea.vmem [#allocation5], %s545_s16  ;;  %s484_s4 = smov [#allocation12]  }
  0x27   :  { %v326_v36 = vld [vmem:[%s575_s3] ss:$0 sm:$0xff]  ;;  %132 = vst [vmem:[#allocation2 + $0x8] sm:$0x1] %v131_v30  ;;  %v143_v37 = vadd.f32 %v142_v25, %v141_v34  ;;  %s152_s27 = scalar_lea.vmem [#allocation5], %s547_s18  ;;  %v189_v56 = vsub.f32 1.0, %v188_v55 }
  0x28   :  { %v147_v38 = vld [vmem:[%s146_s26] sm:$0x1]  ;;  %138 = vst [vmem:[#allocation2 + $0x9] sm:$0x1] %v137_v33  ;;  %s158_s28 = scalar_lea.vmem [#allocation5], %s549_s20  ;;  %s266_s30 = sshll.u32 %s484_s4, 4  ;;  %s267_s30 = int_to_ptr.vmem [resolvable:$true] %s266_s30 }
  0x29   :  { %v149_v39 = vadd.f32 %v148_v27, %v147_v38  ;;  %v153_v40 = vld [vmem:[%s152_s27] sm:$0x1]  ;;  %144 = vst [vmem:[#allocation2 + $0xa] sm:$0x1] %v143_v37  ;;  %s164_s29 = scalar_lea.vmem [#allocation5], %s551_s21  ;;  %v190_v57 = vmul.f32 %v330_v54, %v189_v56  ;;  %s268_s11 = sshll.u32 %s580_s8, 4  ;;  %s269_s11 = int_to_ptr.hbm [resolvable:$true] %s268_s11 }
  0x2a   :  { %v155_v41 = vadd.f32 %v154_v29, %v153_v40  ;;  %v159_v42 = vld [vmem:[%s158_s28] sm:$0x1]  ;;  %s170_s3 = scalar_lea.vmem [#allocation5], %s314_s1  ;;  %v327_v18 = vld [vmem:[#allocation10] ss:$0 sm:$0xff]  ;;  %s485_s14 = smov [#allocation11]  }
  0x2b   :  { %150 = vst [vmem:[#allocation2 + $0xb] sm:$0x1] %v149_v39  ;;  %v161_v43 = vadd.f32 %v160_v32, %v159_v42  ;;  %v165_v44 = vld [vmem:[%s164_s29] sm:$0x1]  ;;  %v191_v58 = vadd.f32 %v330_v54, %v190_v57  ;;  %s252_s0 = sshll.u32 %s485_s14, 4  ;;  %s254_s17 = sshll.u32 %s579_s7, 4  ;;  %s253_s0 = int_to_ptr.vmem [resolvable:$true] %s252_s0  ;;  %s255_s17 = int_to_ptr.hbm [resolvable:$true] %s254_s17 }
  0x2c   :  { %156 = vst [vmem:[#allocation2 + $0xc] sm:$0x1] %v155_v41  ;;  %v167_v45 = vadd.f32 %v166_v35, %v165_v44  ;;  %v171_v49 = vld [vmem:[%s170_s3] sm:$0x1]  ;;  %s487_s18 = smov 8  }
  0x2d   :  { %v175_v47 = vld [vmem:[#allocation2] sm:$0xff]  ;;  %162 = vst [vmem:[#allocation2 + $0xd] sm:$0x1] %v161_v43  ;;  %v173_v50 = vadd.f32 %v172_v46, %v171_v49  ;;  %v193_v59 = vsel %vm192_vm0, %v330_v54, %v191_v58 }
  0x2e   :  { %v181_v48 = vadd.f32 %v326_v36, %v175_v47  ;;  %168 = vst [vmem:[#allocation2 + $0xe] sm:$0x1] %v167_v45  ;;  %v244_v7 = vld [vmem:[%s578_s6] sm:$0x3] }
  0x2f   :  { %174 = vst [vmem:[#allocation2 + $0xf] sm:$0x1] %v173_v50  ;;  %v245_v8 = vsub.f32 1.0, %v244_v7  ;;  %v328_v23 = vld [vmem:[%s577_s5] ss:$0 sm:$0xff]  ;;  %s486_s5 = smov 128  }
  0x30   :  { %183 = vadd.xlane.f32.xlu0 %v181_v48 }
  0x31   :  { %247 = vst.msk [vmem:[#allocation12] sm:$0x3] %vm246_vm1, %v245_v8 }
  0x32   :  { %271 = dma.vmem_to_hbm [thread:$0]  %s267_s30, 32, %s269_s11, [#allocation13]  }
  0x36   :  { %v176_v51 = vld [vmem:[#allocation2 + $0x8] sm:$0xff] }
  0x37   :  { %v182_v52 = vadd.f32 %v326_v36, %v176_v51 }
  0x39   :  { %185 = vadd.xlane.f32.xlu0 %v182_v52 }
  0xa3   :  { %v184_v60 = vpop.xlane.xlu0 %183 }
  0xa4   :  { %v194_v61 = vmul.f32 %v193_v59, %v184_v60 }
  0xa6   :  { %v196_v62 = vsub.f32 %v181_v48, %v194_v61 }
  0xa8   :  { %v198_v63 = vmul.f32 %v196_v62, %v196_v62 }
  0xaa   :  { %200 = vadd.xlane.f32.xlu1 %v198_v63 }
  0xac   :  { %v186_v0 = vpop.xlane.xlu0 %185 }
  0xad   :  { %v195_v1 = vmul.f32 %v193_v59, %v186_v0 }
  0xaf   :  { %v197_v2 = vsub.f32 %v182_v52, %v195_v1 }
  0xb1   :  { %v199_v3 = vmul.f32 %v197_v2, %v197_v2 }
  0xb3   :  { %202 = vadd.xlane.f32.xlu1 %v199_v3 }
 0x11d   :  { %v201_v4 = vpop.xlane.xlu1 %200 }
 0x11e   :  { %v204_v5 = vmul.f32 %v201_v4, %v193_v59 }
 0x120   :  { %v206_v6 = vadd.f32 1e-12, %v204_v5 }
 0x122   :  { %331 = vrsqrt.f32 %v206_v6  ;;  %vm214_vm3 = vweird.f32 %v206_v6 }
 0x126   :  { %v203_v10 = vpop.xlane.xlu1 %202 }
 0x127   :  { %v205_v12 = vmul.f32 %v203_v10, %v193_v59 }
 0x128   :  { %v332_v9 = vpop.eup %331 }
 0x129   :  { %v209_v11 = vmul.f32 %v332_v9, %v206_v6  ;;  %v207_v14 = vadd.f32 1e-12, %v205_v12  ;;  %vm215_vm2 = vweird.f32 %v332_v9 }
 0x12a   :  { %vm216_vm4 = vmor %vm214_vm3, %vm215_vm2 }
 0x12b   :  { %v210_v13 = vmul.f32 %v332_v9, %v209_v11  ;;  %333 = vrsqrt.f32 %v207_v14  ;;  %vm224_vm6 = vweird.f32 %v207_v14 }
 0x12d   :  { %v211_v15 = vmul.f32 0.5, %v210_v13 }
 0x12f   :  { %v212_v16 = vsub.f32 1.5, %v211_v15 }
 0x131   :  { %v213_v17 = vmul.f32 %v332_v9, %v212_v16  ;;  %v334_v19 = vpop.eup %333 }
 0x132   :  { %v219_v22 = vmul.f32 %v334_v19, %v207_v14  ;;  %vm225_vm5 = vweird.f32 %v334_v19 }
 0x133   :  { %v217_v20 = vsel %vm216_vm4, %v332_v9, %v213_v17  ;;  %vm226_vm7 = vmor %vm224_vm6, %vm225_vm5 }
 0x134   :  { %v228_v21 = vmul.f32 %v217_v20, %v196_v62  ;;  %v220_v25 = vmul.f32 %v334_v19, %v219_v22 }
 0x136   :  { %v234_v24 = vmul.f32 %v327_v18, %v228_v21  ;;  %v221_v26 = vmul.f32 0.5, %v220_v25 }
 0x138   :  { %v240_v27 = vadd.f32 %v328_v23, %v234_v24  ;;  %v222_v28 = vsub.f32 1.5, %v221_v26 }
 0x13a   :  { %242 = vst [vmem:[#allocation11] sm:$0xff] %v240_v27  ;;  %v223_v29 = vmul.f32 %v334_v19, %v222_v28 }
 0x13c   :  { %v227_v30 = vsel %vm226_vm7, %v334_v19, %v223_v29 }
 0x13d   :  { %v229_v31 = vmul.f32 %v227_v30, %v197_v2 }
 0x13f   :  { %v235_v32 = vmul.f32 %v327_v18, %v229_v31 }
 0x141   :  { %v241_v33 = vadd.f32 %v328_v23, %v235_v32 }
 0x143   :  { %243 = vst [vmem:[#allocation11 + $0x8] sm:$0xff] %v241_v33 }
 0x144   :  { %260 = dma.vmem_to_hbm [thread:$0]  %s253_s0, 256, %s255_s17, [#allocation7], %s486_s5, %s486_s5, %s487_s18  }
 0x145   :  { %473 = dma.done.wait [#allocation7], 256  }
 0x146   :  { %474 = vsyncadd [#allocation7], 4294967040 }
 0x147   :  { %475 = dma.done.wait [#allocation13], 32  }
 0x148   :  { %476 = vsyncadd [#allocation13], 4294967264 }
 0x149   :  { %280 = vsyncpa [#allocation6], 1 }
 0x14a   :  { %281 = vsyncpa [#allocation9], 1 }
 0x14b   :  { %282 = vsyncpa [#allocation7], 1 }
 0x14c   :  { %283 = vsyncpa [#allocation13], 1 }

</bundles_post_ra>
